<compile_context>
chip_gen: v7x
topology: tpu7x:2x2x1
jax: 0.10.0
libtpu: 0.0.40
codegen_flags: <defaults>
</compile_context>

<pallas_src>
import functools

import jax
import jax.numpy as jnp
import numpy as np
from jax import lax
from jax.experimental import pallas as pl
from jax.experimental.pallas import tpu as pltpu


def _attn_kernel(x_ref, wq_ref, bq_ref, wkv_ref, bkv_ref, bo_ref, out_ref,
                 k_ref, vo1_ref, *, channels, q_tile, exp_dtype, cache_kv):
    """One (batch, query-tile) grid step.

    x_ref   : (1, C, N)    raw f32 features (freq scale folded into weights), N = H*W
    wq_ref  : (C, C)       query weight, pre-scaled by fw and 1/sqrt(C), bf16
    bq_ref  : (C, 1)       query bias (pre-scaled by 1/sqrt(C)), f32
    wkv_ref : (2C+1, C)    stacked [Wk*fw ; (Wo@Wv)*fw ; zeros], bf16
    bkv_ref : (2C+1, 1)    stacked [bk ; Wo@bv ; 1.0], f32
    bo_ref  : (C, 1)       output bias, f32
    out_ref : (1, C, tq)   output tile (f32 or bf16)
    k_ref   : (C, N)       bf16 scratch: cached keys
    vo1_ref : (C+1, N)     bf16 scratch: cached [v∘o ; ones] rows
    """
    C = channels
    qi = pl.program_id(1)
    q_start = pl.multiple_of(qi * q_tile, q_tile)

    def compute_kv():
        x = x_ref[0].astype(jnp.bfloat16)                               # (C, N)
        kv = (jnp.dot(wkv_ref[...], x, preferred_element_type=jnp.float32)
              + bkv_ref[...]).astype(jnp.bfloat16)                      # (2C+1, N)
        k_ref[...] = kv[0:C, :]
        vo1_ref[...] = kv[C:2 * C + 1, :]

    if cache_kv:
        # K / V∘O / ones projection once per batch row (qi axis is "arbitrary").
        @pl.when(qi == 0)
        def _():
            compute_kv()
    else:
        # B == 1 fallback: recompute per tile so the qi axis can feed both TensorCores.
        compute_kv()

    # Query projection for this tile (fw and 1/sqrt(C) already folded in).
    x_t = x_ref[0, :, pl.ds(q_start, q_tile)].astype(jnp.bfloat16)      # (C, tq)
    q_t = (jnp.dot(wq_ref[...], x_t, preferred_element_type=jnp.float32)
           + bq_ref[...]).astype(jnp.bfloat16)                          # (C, tq)

    k = k_ref[...]                                                      # (C, N)   bf16
    vo1 = vo1_ref[...]                                                  # (C+1, N) bf16

    # scores[t, n] = sum_c q_t[c, t] * k[c, n]   (contract channel dims, no .T)
    scores = lax.dot_general(
        q_t, k, dimension_numbers=(((0,), (0,)), ((), ())),
        preferred_element_type=jnp.float32)                             # (tq, N)

    # Un-normalized softmax probabilities.  exp in bf16 on chips with a bf16 EUP.
    s_max = jnp.max(scores, axis=-1, keepdims=True)
    p = jnp.exp((scores - s_max).astype(exp_dtype)).astype(jnp.bfloat16)  # (tq, N)

    # [out_un ; l] = [v∘o ; ones] @ p^T : the MXU computes the attention output AND the
    # softmax row-sums l in one pass (f32 accumulation).
    res = lax.dot_general(
        vo1, p, dimension_numbers=(((1,), (1,)), ((), ())),
        preferred_element_type=jnp.float32)                             # (C+1, tq)
    inv_l = pl.reciprocal(res[C:C + 1, :], approx=True)                 # (1, tq)
    out = res[0:C, :] * inv_l + bo_ref[...]                             # (C, tq)
    out_ref[0] = out.astype(out_ref.dtype)


def _vmem_capacity_bytes():
    try:
        return int(pltpu.get_tpu_info().vmem_capacity_bytes)
    except Exception:
        return 64 << 20   # v7x-sized conservative fallback


def _vmem_bytes_estimate(C, N, tq, out_bytes):
    x_blk = C * N * 4 * 2                 # f32 x block, double-buffered
    kv = (2 * C + 1) * N * 2              # bf16 k / v∘o / ones scratch
    soft = 3 * tq * N * 4                 # scores + exp + matmul staging (f32-sized)
    out_blk = C * tq * out_bytes * 2      # output block, double-buffered
    wts = ((2 * C + 1) * C + C * C) * 2 + (4 * C + 2) * 4
    return x_blk + kv + soft + out_blk + wts + (2 << 20)   # +2 MiB slack


def _pick_q_tile(C, N, out_bytes, budget):
    """Largest lane-aligned query tile that divides N and fits the VMEM budget."""
    if N % 128 != 0:
        return N            # block must equal the full dim when not lane-aligned
    for t in (1024, 512, 384, 256, 128):
        if N % t == 0 and _vmem_bytes_estimate(C, N, t, out_bytes) <= budget:
            return t
    # TODO(synk): even tq=128 with the whole key axis resident can exceed VMEM for very
    # large N (esp. v7x 64 MiB); add key-axis tiling + online softmax for that regime.
    return 128


def _default_exp_dtype():
    # bf16 EUP exists on v6e/v7x; v5e and older have no bf16 EUP/VPU -> stay f32.
    try:
        kind = jax.devices()[0].device_kind.lower()
    except Exception:
        return jnp.float32
    if ("v6" in kind) or ("v7" in kind) or ("7x" in kind):
        return jnp.bfloat16
    return jnp.float32


def frequency_self_attention3(x, params, *, q_tile=None, out_dtype=jnp.float32,
                              exp_dtype=None):
    """x: (B, C, H, W) float32 (NCHW, like the PyTorch module)."""
    B, C, H, W = x.shape
    N = H * W
    out_bytes = jnp.dtype(out_dtype).itemsize
    if exp_dtype is None:
        exp_dtype = _default_exp_dtype()

    # NCHW -> (B, C, N): pure reshape, no copy, no elementwise HBM pass (freq scale is
    # folded into the weights below; the bf16 cast happens inside the kernel).
    xf = x.reshape(B, C, N)

    # --- fold / fuse all the linear pieces once (tiny, weight-sized precompute) ------
    fw = params["freq_weights"]                                   # per-channel scale
    scale = 1.0 / (C ** 0.5)
    wq = (params["wq"] * fw[None, :] * scale).astype(jnp.bfloat16)          # (C, C)
    bq = (params["bq"][0] * scale)[:, None]                                 # (C, 1)
    wk = params["wk"] * fw[None, :]                                         # (C, C)
    w_vo = (params["wo"] @ params["wv"]) * fw[None, :]                      # (C, C)
    b_v = params["wo"] @ params["bv"][0]                                    # (C,)
    # Extra zero-weight row with bias 1.0 -> cached "ones" row for MXU row-sums.
    w_kvo = jnp.concatenate(
        [wk, w_vo, jnp.zeros((1, C), wk.dtype)], axis=0).astype(jnp.bfloat16)  # (2C+1,C)
    b_kvo = jnp.concatenate(
        [params["bk"][0], b_v, jnp.ones((1,), jnp.float32)], axis=0)[:, None]  # (2C+1,1)
    b_out = params["bo"][0][:, None]                                           # (C, 1)

    # --- VMEM-aware tiling ------------------------------------------------------------
    cap = _vmem_capacity_bytes()
    budget = int(cap * 0.6)
    tq = _pick_q_tile(C, N, out_bytes, budget) if q_tile is None else q_tile
    assert N % tq == 0
    n_qt = N // tq
    # Cache the K/V∘O projection across query tiles unless B==1 would starve a core.
    cache_kv = not (B == 1 and n_qt > 1)
    dims = ("parallel", "arbitrary") if cache_kv else ("parallel", "parallel")
    vmem_limit = int(min(cap * 0.9,
                         max(_vmem_bytes_estimate(C, N, tq, out_bytes) + (8 << 20),
                             32 << 20)))

    flops = B * 2 * ((2 * C + 1) * C * N        # fused K/V∘O/ones projection
                     + C * C * N                # Q projection
                     + C * N * N                # scores
                     + (C + 1) * N * N)         # att @ [v∘o ; ones]
    cost = pl.CostEstimate(
        flops=int(flops),
        transcendentals=int(B * N * N),
        bytes_accessed=int(B * C * N * 4 + B * C * N * out_bytes
                           + (w_kvo.size + wq.size) * 2
                           + (b_kvo.size + bq.size + b_out.size) * 4))

    kernel = functools.partial(_attn_kernel, channels=C, q_tile=tq,
                               exp_dtype=exp_dtype, cache_kv=cache_kv)

    out = pl.pallas_call(
        kernel,
        out_shape=jax.ShapeDtypeStruct((B, C, N), out_dtype),
        grid=(B, n_qt),
        in_specs=[
            pl.BlockSpec((1, C, N), lambda b, qi: (b, 0, 0)),        # x (raw f32)
            pl.BlockSpec((C, C), lambda b, qi: (0, 0)),              # Wq'
            pl.BlockSpec((C, 1), lambda b, qi: (0, 0)),              # bq'
            pl.BlockSpec((2 * C + 1, C), lambda b, qi: (0, 0)),      # [Wk';WoWv';0]
            pl.BlockSpec((2 * C + 1, 1), lambda b, qi: (0, 0)),      # [bk;Wo bv;1]
            pl.BlockSpec((C, 1), lambda b, qi: (0, 0)),              # bo
        ],
        out_specs=pl.BlockSpec((1, C, tq), lambda b, qi: (b, 0, qi)),
        scratch_shapes=[
            pltpu.VMEM((C, N), jnp.bfloat16),        # cached K
            pltpu.VMEM((C + 1, N), jnp.bfloat16),    # cached [V∘O ; ones]
        ],
        compiler_params=pltpu.CompilerParams(
            dimension_semantics=dims, vmem_limit_bytes=vmem_limit),
        cost_estimate=cost,
    )(xf, wq, bq, w_kvo, b_kvo, b_out)

    # (B, C, N) -> NCHW is again a pure reshape.
    return out.reshape(B, C, H, W)


def _reference(x, params):
    """Pure-JAX reference matching the PyTorch forward exactly (incl. the FFT path)."""
    B, C, H, W = x.shape
    fw = params["freq_weights"]
    freq = jnp.fft.fft2(x, axes=(-2, -1))
    refined = jnp.real(
        jnp.fft.ifft2(jnp.abs(freq) * fw[None, :, None, None]
                      * jnp.exp(1j * jnp.angle(freq)), axes=(-2, -1))
    ).astype(jnp.float32)

    def conv1x1(z, w, b):
        return jnp.einsum("bchw,oc->bohw", z, w) + b[None, :, None, None]

    q = conv1x1(refined, params["wq"], params["bq"][0])
    k = conv1x1(refined, params["wk"], params["bk"][0])
    v = conv1x1(refined, params["wv"], params["bv"][0])

    qf = q.reshape(B, C, -1)
    kf = k.reshape(B, C, -1)
    vf = v.reshape(B, C, -1)
    scores = jnp.einsum("bcn,bcm->bnm", qf, kf) / (C ** 0.5)
    att = jax.nn.softmax(scores, axis=-1)
    ra = jnp.einsum("bnm,bcm->bnc", att, vf).transpose(0, 2, 1)   # (B, C, N)
    ra = ra.reshape(B, C, H, W)
    return conv1x1(ra, params["wo"], params["bo"][0])


def _init_params(key, channels):
    ks = jax.random.split(key, 8)
    def w(k):
        return jax.random.normal(k, (channels, channels), jnp.float32) * 0.1
    def b(k):
        return jax.random.normal(k, (1, channels), jnp.float32) * 0.05
    return {
        "wq": w(ks[0]), "bq": b(ks[1]),
        "wk": w(ks[2]), "bk": b(ks[3]),
        "wv": w(ks[4]), "bv": b(ks[5]),
        "wo": w(ks[6]), "bo": b(ks[7]),
        # module __init__ uses ones; use a deterministic non-trivial variant
        "freq_weights": jnp.linspace(0.5, 1.5, channels, dtype=jnp.float32),
    }


if __name__ == "__main__":
    B, C, H, W = 2, 4, 16, 16
    key = jax.random.PRNGKey(0)
    kx, kp = jax.random.split(key)
    x = jax.random.normal(kx, (B, C, H, W), jnp.float32)
    params = _init_params(kp, C)

    ref = jax.block_until_ready(_reference(x, params))

    # f32 writeback (module semantics). bf16 MXU operands / f32 accumulation, approx
    # softmax reciprocal, and bf16 exp on v6e/v7x vs the f32 FFT-path reference:
    # errors land around 1e-4..1e-3, inside this tolerance.
    out = jax.block_until_ready(jax.jit(frequency_self_attention3)(x, params))
    np.testing.assert_allclose(np.asarray(out), np.asarray(ref),
                               rtol=5e-3, atol=3e-3)

    # bf16 writeback path (halves output HBM traffic); looser tolerance for the cast.
    fwd_bf16 = jax.jit(functools.partial(frequency_self_attention3,
                                         out_dtype=jnp.bfloat16))
    out_bf = jax.block_until_ready(fwd_bf16(x, params))
    np.testing.assert_allclose(np.asarray(out_bf.astype(jnp.float32)),
                               np.asarray(ref), rtol=2e-2, atol=1e-2)

    print("KERNEL_OK")
</pallas_src>

<mosaic_0001>
module attributes {stable_mosaic.version = 11 : i64} {
  func.func @_attn_kernel(%arg0: i32, %arg1: i32, %arg2: memref<1x4x256xf32, #tpu.memory_space<vmem>>, %arg3: memref<4x4xbf16, #tpu.memory_space<vmem>>, %arg4: memref<4x1xf32, #tpu.memory_space<vmem>>, %arg5: memref<9x4xbf16, #tpu.memory_space<vmem>>, %arg6: memref<9x1xf32, #tpu.memory_space<vmem>>, %arg7: memref<4x1xf32, #tpu.memory_space<vmem>>, %arg8: memref<1x4x256xf32, #tpu.memory_space<vmem>>, %arg9: memref<4x256xbf16, #tpu.memory_space<vmem>>, %arg10: memref<5x256xbf16, #tpu.memory_space<vmem>>) attributes {dimension_semantics = [#tpu.dimension_semantics<parallel>, #tpu.dimension_semantics<arbitrary>], iteration_bounds = array<i64: 2, 1>, scalar_prefetch = 0 : i64, scratch_operands = 2 : i64, tpu.core_type = #tpu.core_type<tc>, window_params = [{transform_indices = @transform_0, window_bounds = array<i64: 1, 4, 256>}, {pipeline_mode = #tpu.pipeline_mode<synchronous>, transform_indices = @transform_1, window_bounds = array<i64: 4, 4>}, {pipeline_mode = #tpu.pipeline_mode<synchronous>, transform_indices = @transform_2, window_bounds = array<i64: 4, 1>}, {pipeline_mode = #tpu.pipeline_mode<synchronous>, transform_indices = @transform_3, window_bounds = array<i64: 9, 4>}, {pipeline_mode = #tpu.pipeline_mode<synchronous>, transform_indices = @transform_4, window_bounds = array<i64: 9, 1>}, {pipeline_mode = #tpu.pipeline_mode<synchronous>, transform_indices = @transform_5, window_bounds = array<i64: 4, 1>}, {transform_indices = @transform_6, window_bounds = array<i64: 1, 4, 256>}]} {
    %c256_i32 = arith.constant 256 : i32
    %0 = arith.muli %arg1, %c256_i32 : i32
    %1 = tpu.assume_multiple %0, 256 : i32
    %c0_i32 = arith.constant 0 : i32
    %2 = arith.cmpi eq, %arg1, %c0_i32 : i32
    %3 = arith.extui %2 : i1 to i32
    %c0_i32_0 = arith.constant 0 : i32
    %4 = arith.cmpi ne, %3, %c0_i32_0 : i32
    scf.if %4 {
      %c0_18 = arith.constant 0 : index
      %c0_19 = arith.constant 0 : index
      %c0_20 = arith.constant 0 : index
      %36 = vector.load %arg2[%c0_18, %c0_19, %c0_20] : memref<1x4x256xf32, #tpu.memory_space<vmem>>, vector<1x4x256xf32>
      %37 = vector.shape_cast %36 : vector<1x4x256xf32> to vector<4x256xf32>
      %38 = arith.truncf %37 : vector<4x256xf32> to vector<4x256xbf16>
      %c0_21 = arith.constant 0 : index
      %c0_22 = arith.constant 0 : index
      %39 = vector.load %arg5[%c0_21, %c0_22] : memref<9x4xbf16, #tpu.memory_space<vmem>>, vector<9x4xbf16>
      %cst_23 = arith.constant dense<0.000000e+00> : vector<9x256xf32>
      %40 = tpu.matmul %39, %38, %cst_23 {dimension_numbers = #tpu.dot_dimension_numbers<[1], [0], [0], [1], [0, 0, 1, 1], [], []>} : vector<9x4xbf16>, vector<4x256xbf16>, vector<9x256xf32> -> vector<9x256xf32>
      %c0_24 = arith.constant 0 : index
      %c0_25 = arith.constant 0 : index
      %41 = vector.load %arg6[%c0_24, %c0_25] : memref<9x1xf32, #tpu.memory_space<vmem>>, vector<9x1xf32>
      %42 = vector.broadcast %41 : vector<9x1xf32> to vector<9x256xf32>
      %43 = arith.addf %40, %42 : vector<9x256xf32>
      %44 = arith.truncf %43 : vector<9x256xf32> to vector<9x256xbf16>
      %45 = vector.extract_strided_slice %44 {offsets = [0, 0], sizes = [4, 256], strides = [1, 1]} : vector<9x256xbf16> to vector<4x256xbf16>
      %c0_26 = arith.constant 0 : index
      %c0_27 = arith.constant 0 : index
      %46 = vector.load %arg9[%c0_26, %c0_27] : memref<4x256xbf16, #tpu.memory_space<vmem>>, vector<4x256xbf16>
      tpu.vector_store %arg9[%c0_26, %c0_27], %45 {strides = array<i32>} : memref<4x256xbf16, #tpu.memory_space<vmem>>, vector<4x256xbf16>,
      %47 = vector.extract_strided_slice %44 {offsets = [4, 0], sizes = [5, 256], strides = [1, 1]} : vector<9x256xbf16> to vector<5x256xbf16>
      %c0_28 = arith.constant 0 : index
      %c0_29 = arith.constant 0 : index
      %48 = vector.load %arg10[%c0_28, %c0_29] : memref<5x256xbf16, #tpu.memory_space<vmem>>, vector<5x256xbf16>
      tpu.vector_store %arg10[%c0_28, %c0_29], %47 {strides = array<i32>} : memref<5x256xbf16, #tpu.memory_space<vmem>>, vector<5x256xbf16>,
    } else {
    }
    %c0 = arith.constant 0 : index
    %c0_1 = arith.constant 0 : index
    %5 = arith.index_cast %1 : i32 to index
    %6 = vector.load %arg2[%c0, %c0_1, %5] : memref<1x4x256xf32, #tpu.memory_space<vmem>>, vector<1x4x256xf32>
    %7 = vector.shape_cast %6 : vector<1x4x256xf32> to vector<4x256xf32>
    %8 = arith.truncf %7 : vector<4x256xf32> to vector<4x256xbf16>
    %c0_2 = arith.constant 0 : index
    %c0_3 = arith.constant 0 : index
    %9 = vector.load %arg3[%c0_2, %c0_3] : memref<4x4xbf16, #tpu.memory_space<vmem>>, vector<4x4xbf16>
    %cst = arith.constant dense<0.000000e+00> : vector<4x256xf32>
    %10 = tpu.matmul %9, %8, %cst {dimension_numbers = #tpu.dot_dimension_numbers<[1], [0], [0], [1], [0, 0, 1, 1], [], []>} : vector<4x4xbf16>, vector<4x256xbf16>, vector<4x256xf32> -> vector<4x256xf32>
    %c0_4 = arith.constant 0 : index
    %c0_5 = arith.constant 0 : index
    %11 = vector.load %arg4[%c0_4, %c0_5] : memref<4x1xf32, #tpu.memory_space<vmem>>, vector<4x1xf32>
    %12 = vector.broadcast %11 : vector<4x1xf32> to vector<4x256xf32>
    %13 = arith.addf %10, %12 : vector<4x256xf32>
    %14 = arith.truncf %13 : vector<4x256xf32> to vector<4x256xbf16>
    %c0_6 = arith.constant 0 : index
    %c0_7 = arith.constant 0 : index
    %15 = vector.load %arg9[%c0_6, %c0_7] : memref<4x256xbf16, #tpu.memory_space<vmem>>, vector<4x256xbf16>
    %c0_8 = arith.constant 0 : index
    %c0_9 = arith.constant 0 : index
    %16 = vector.load %arg10[%c0_8, %c0_9] : memref<5x256xbf16, #tpu.memory_space<vmem>>, vector<5x256xbf16>
    %cst_10 = arith.constant dense<0.000000e+00> : vector<256x256xf32>
    %17 = tpu.matmul %14, %15, %cst_10 {dimension_numbers = #tpu.dot_dimension_numbers<[0], [0], [1], [1], [0, 1, 1, 1], [], []>} : vector<4x256xbf16>, vector<4x256xbf16>, vector<256x256xf32> -> vector<256x256xf32>
    %cst_11 = arith.constant dense<0xFF800000> : vector<256xf32>
    %18 = vector.multi_reduction <maximumf>, %17, %cst_11 [1] : vector<256x256xf32> to vector<256xf32>
    %19 = vector.shape_cast %18 : vector<256xf32> to vector<256x1xf32>
    %20 = vector.broadcast %19 : vector<256x1xf32> to vector<256x256xf32>
    %21 = arith.subf %17, %20 : vector<256x256xf32>
    %22 = math.exp %21 : vector<256x256xf32>
    %23 = arith.truncf %22 : vector<256x256xf32> to vector<256x256xbf16>
    %cst_12 = arith.constant dense<0.000000e+00> : vector<5x256xf32>
    %24 = tpu.matmul %16, %23, %cst_12 {dimension_numbers = #tpu.dot_dimension_numbers<[1], [1], [0], [0], [0, 0, 1, 0], [], []>} : vector<5x256xbf16>, vector<256x256xbf16>, vector<5x256xf32> -> vector<5x256xf32>
    %25 = vector.extract_strided_slice %24 {offsets = [4, 0], sizes = [1, 256], strides = [1, 1]} : vector<5x256xf32> to vector<1x256xf32>
    %26 = tpu.reciprocal %25 {approx = true} : vector<1x256xf32> -> vector<1x256xf32>
    %27 = vector.extract_strided_slice %24 {offsets = [0, 0], sizes = [4, 256], strides = [1, 1]} : vector<5x256xf32> to vector<4x256xf32>
    %28 = vector.broadcast %26 : vector<1x256xf32> to vector<4x256xf32>
    %29 = arith.mulf %27, %28 : vector<4x256xf32>
    %c0_13 = arith.constant 0 : index
    %c0_14 = arith.constant 0 : index
    %30 = vector.load %arg7[%c0_13, %c0_14] : memref<4x1xf32, #tpu.memory_space<vmem>>, vector<4x1xf32>
    %31 = vector.broadcast %30 : vector<4x1xf32> to vector<4x256xf32>
    %32 = arith.addf %29, %31 : vector<4x256xf32>
    %c0_15 = arith.constant 0 : index
    %c0_16 = arith.constant 0 : index
    %c0_17 = arith.constant 0 : index
    %33 = vector.load %arg8[%c0_15, %c0_16, %c0_17] : memref<1x4x256xf32, #tpu.memory_space<vmem>>, vector<1x4x256xf32>
    %34 = vector.shape_cast %33 : vector<1x4x256xf32> to vector<4x256xf32>
    %35 = vector.shape_cast %32 : vector<4x256xf32> to vector<1x4x256xf32>
    tpu.vector_store %arg8[%c0_15, %c0_16, %c0_17], %35 {strides = array<i32>} : memref<1x4x256xf32, #tpu.memory_space<vmem>>, vector<1x4x256xf32>,
    return
  }
  func.func @transform_0(%arg0: i32, %arg1: i32) -> (i32, i32, i32) {
    %c0_i32 = arith.constant 0 : i32
    %c0_i32_0 = arith.constant 0 : i32
    %c0_i32_1 = arith.constant 0 : i32
    return %arg0, %c0_i32, %c0_i32_0 : i32, i32, i32
  }
  func.func @transform_1(%arg0: i32, %arg1: i32) -> (i32, i32) {
    %c0_i32 = arith.constant 0 : i32
    %c0_i32_0 = arith.constant 0 : i32
    %c0_i32_1 = arith.constant 0 : i32
    return %c0_i32, %c0_i32_0 : i32, i32
  }
  func.func @transform_2(%arg0: i32, %arg1: i32) -> (i32, i32) {
    %c0_i32 = arith.constant 0 : i32
    %c0_i32_0 = arith.constant 0 : i32
    %c0_i32_1 = arith.constant 0 : i32
    return %c0_i32, %c0_i32_0 : i32, i32
  }
  func.func @transform_3(%arg0: i32, %arg1: i32) -> (i32, i32) {
    %c0_i32 = arith.constant 0 : i32
    %c0_i32_0 = arith.constant 0 : i32
    %c0_i32_1 = arith.constant 0 : i32
    return %c0_i32, %c0_i32_0 : i32, i32
  }
  func.func @transform_4(%arg0: i32, %arg1: i32) -> (i32, i32) {
    %c0_i32 = arith.constant 0 : i32
    %c0_i32_0 = arith.constant 0 : i32
    %c0_i32_1 = arith.constant 0 : i32
    return %c0_i32, %c0_i32_0 : i32, i32
  }
  func.func @transform_5(%arg0: i32, %arg1: i32) -> (i32, i32) {
    %c0_i32 = arith.constant 0 : i32
    %c0_i32_0 = arith.constant 0 : i32
    %c0_i32_1 = arith.constant 0 : i32
    return %c0_i32, %c0_i32_0 : i32, i32
  }
  func.func @transform_6(%arg0: i32, %arg1: i32) -> (i32, i32, i32) {
    %c0_i32 = arith.constant 0 : i32
    %c0_i32_0 = arith.constant 0 : i32
    return %arg0, %c0_i32, %arg1 : i32, i32, i32
  }
}

</mosaic_0001>

<bundles_post_ra>
// kernel: frequency_self_attention3.1
= control target key start
LH: loop header
LB: loop body
LE: loop exit
PB: predicated region body
PF: predicated region fallthrough
CT: control target
= control target key end

     0   :  { %s1503_s21 = smov 0   ;;  %s1505_s22 = smov 0   ;;  %s1877_s0 = inlined_call_operand.vmem [shape: f32[2,4,256], index: 0, kind: input, shape index: {}]   ;;  %s1878_s1 = inlined_call_operand.vmem [shape: bf16[4,4], index: 1, kind: input, shape index: {}]   ;;  %s1879_s2 = inlined_call_operand.vmem [shape: f32[4,1], index: 2, kind: input, shape index: {}]   ;;  %s1880_s3 = inlined_call_operand.vmem [shape: bf16[9,4], index: 3, kind: input, shape index: {}]   ;;  %s1881_s4 = inlined_call_operand.vmem [shape: f32[9,1], index: 4, kind: input, shape index: {}]   ;;  %s1882_s5 = inlined_call_operand.vmem [shape: f32[4,1], index: 5, kind: input, shape index: {}]   ;;  %s1883_s6 = inlined_call_operand.vmem [shape: f32[2,4,256], index: 6, kind: output, shape index: {}]  }
   0x1   :  { %s1507_s23 = smov 0  }
   0x2 LB: > { %s28_s24 = sadd.s32 1, %s1461_s22  ;;  %p1239_p0 = scmp.ge.s32.totalorder %s1465_s23, 1  ;;  %s1465_s23 = sphi %s1507_s23, %s16_s23   ;;  %s1461_s22 = sphi %s1505_s22, %s1933_s22   ;;  %s1457_s21 = sphi %s1503_s21, %s1932_s21  }
   0x3   : > { %p30_p1 = scmp.ge.s32.totalorder %s28_s24, 2  ;;  %p226_p2 = scmp.lt.s32.totalorder %s1465_s23, 3 }
   0x5   : > { %s1935_s24 = smov (%p30_p1, %s28_s24), 0  ;;  %p227_p3 = pnand %p1239_p0, %p226_p2 }
   0x7   : > { %230 = sbr.rel (%p227_p3) target bundleno = 1087 (0x43f), region = 44 }
   0xe   : > { %p260_p4 = scmp.lt.s32.totalorder %s1457_s21, 1  ;;  %v1467_v0 = vmov 0   ;;  %v409_v1 = vld [vmem:[%s1879_s2] sm:$0xf]  ;;  %vm310_vm0 = vcmask 1041408   ;;  %vm306_vm1 = vcmask 31744  }
   0xf   : > { %349 = vmatprep.mubr.bf16.mxu0 %v1467_v0  ;;  %458 = vmatprep.mubr.bf16.mxu1 %v1467_v0  ;;  %v289_v2 = vld [vmem:[%s1881_s4] sm:$0xff]  ;;  %vm388_vm2 = vcmask 1042432   ;;  %vm389_vm3 = vsmask.f32 2304  ;;  %vm391_vm4 = vcmask 1046532   ;;  %vm381_vm6 = vcmask 1045508  }
  0x10   : > { %s1937_s21 = smov (!%p260_p4, %s1457_s21), 1  ;;  %1305 = vset.pattern.permute.xlu0 %v1467_v0  ;;  %v1308_v8 = vld [vmem:[%s1880_s3] sm:$0x1f]   ;;  %vm392_vm5 = vsmask.f32 6400  ;;  %vm1853_vm7 = vmand %vm388_vm2, %vm389_vm3 }
  0x11   : > { %412 = vperm.xlu0 %1305, %v409_v1   ;;  %s1276_s27 = sshll.u32 %s1937_s21, 3  ;;  %v408_v9 = vld [vmem:[%s1878_s1] sm:$0x3]  ;;  %vm393_vm8 = vmand %vm391_vm4, %vm392_vm5 }
  0x12   : > { %s264_s8 = scalar_lea.vmem %s1877_s0, %s1276_s27  ;;  %vm382_vm9 = vmor %vm310_vm0, %vm381_vm6  ;;  %s273_s19 = scalar_lea.vmem %s1883_s6, %s1276_s27 }
  0x13   : > { %v281_v3 = vld [vmem:[%s264_s8] sm:$0xff]  ;;  %vm394_vm10 = vmor %vm393_vm8, %vm1853_vm7 }
  0x14   : > { %v283_v4 = vcombine.high %v281_v3, %v281_v3  ;;  %v285_v5 = vpack.c.bf16 %v281_v3, %v281_v3 }
  0x15   : > { %293 = vperm.xlu0 %1305, %v289_v2  }
  0x16   : > { %v286_v6 = vpack.c.bf16 %v283_v4, %v283_v4  ;;  %v312_v7 = vsel %vm310_vm0, %v285_v5, 0 }
  0x18   : > { %1245 = vmatprep.subr.msk.bf16.mxu0 %vm310_vm0, %v286_v6  ;;  %1252 = vmatprep.subr.msk.bf16.mxu1 %vm310_vm0, %v286_v6 }
  0x19   : > { %318 = vmatpush1.bf16.msra.mxu0 %v312_v7  ;;  %427 = vmatpush1.bf16.msra.mxu1 %v312_v7 }
  0x1c   : > { %1246 = vmatmul.mubr.msk.bf16.vlgmr.msra.gmra.mrb[0].mxu0 %vm306_vm1, %v1308_v8  ;;  %1253 = vmatmul.mubr.msk.bf16.vlgmr.msra.gmra.mrb[0].mxu1 %vm306_vm1, %v408_v9 }
  0x1d   : > { %598 = vmatprep.mubr.bf16.mxu0 %v1467_v0 }
  0x90   : > { %v413_v10 = vpop.permute.xlu0 %412 }
  0x94   : > { %v294_v11 = vpop.permute.xlu0 %293 }
  0xef   : > { %v351_v12 = vpop.f32.mrb[0].mxu0  ;;  %v460_v13 = vpop.f32.mrb[0].mxu1 }
  0xf0   : > { %v352_v14 = vadd.f32 %v351_v12, %v294_v11  ;;  %v353_v15 = vpop.f32.mrb[1].mxu0  ;;  %v462_v16 = vpop.f32.mrb[1].mxu1  ;;  %v461_v17 = vadd.f32 %v460_v13, %v413_v10 }
  0xf1   : > { %v354_v18 = vadd.f32 %v353_v15, %v294_v11  ;;  %v464_v19 = vpop.f32.mrb[2].mxu1  ;;  %v1550_v20 = vpop.f32.mrb[2].mxu0  ;;  %v463_v28 = vadd.f32 %v462_v16, %v413_v10 }
  0xf2   : > { %1898 = vst [vmem:[#allocation4_spill] sm:$0xff] %v1550_v20  ;;  %v465_v21 = vpop.f32.mrb[3].mxu1  ;;  %v467_v22 = vpack.c.bf16 %v461_v17, %v461_v17  ;;  %v1552_v23 = vpop.f32.mrb[3].mxu0 }
  0xf3   : > { %1899 = vst [vmem:[#allocation5_spill] sm:$0xff] %v1552_v23  ;;  %v1554_v24 = vpack.c.bf16 %v354_v18, %v352_v14  ;;  %v468_v29 = vpack.c.bf16 %v463_v28, %v463_v28 }
  0xf4   : > { %471 = vxpose.xlu1.c.b16.start.end [1/1] (short) %v467_v22, 128 }
  0xf5   : > { %1900 = vst [vmem:[#allocation6_spill] sm:$0xff] %v1554_v24  ;;  %1248 = vst.sshfl [vmem:[#allocation2] sm:$0x33 pattern:$0x76325410] %v1554_v24 }
  0xfc   : > { %v1254_v25 = vld.sshfl [vmem:[#allocation2] sm:$0x33 pattern:$0x76325410] }
  0xfd   : > { %v511_v26 = vcombine.high %v1254_v25, %v1254_v25  ;;  %v561_v27 = vsel %vm310_vm0, %v1254_v25, 0 }
  0xff   : > { %1255 = vmatprep.subr.msk.bf16.mxu0 %vm310_vm0, %v511_v26 }
 0x100   : > { %567 = vmatpush1.bf16.msra.mxu0 %v561_v27 }
 0x111   : > { %487 = vxpose.xlu1.c.b16.start.end [1/1] (short) %v468_v29, 128 }
 0x115   : > { %1306 = vset.pattern.permute.xlu1 %v1467_v0 }
 0x15a   : > { %v479_v30 = vpop.trf.xlu1 }
 0x15b   : > { %1256 = vmatmul.mubr.msk.bf16.vlgmr.msra.gmra.mrb[4].mxu0 %vm306_vm1, %v479_v30 }
 0x15c   : > { %608 = vmatprep.mubr.bf16.mxu0 %v1467_v0 }
 0x15e   : > { %v480_v31 = vpop.trf.xlu1 }
 0x162   : > { %v481_v32 = vpop.trf.xlu1 }
 0x163   : > { %1257 = vmatmul.mubr.msk.bf16.gmra.mrb[8].mxu0 %vm306_vm1, %v480_v31 }
 0x164   : > { %618 = vmatprep.mubr.bf16.mxu0 %v1467_v0 }
 0x166   : > { %v482_v33 = vpop.trf.xlu1 }
 0x16a   : > { %v483_v34 = vpop.trf.xlu1 }
 0x16b   : > { %1258 = vmatmul.mubr.msk.bf16.gmra.mrb[12].mxu0 %vm306_vm1, %v481_v32 }
 0x16c   : > { %628 = vmatprep.mubr.bf16.mxu0 %v1467_v0 }
 0x16e   : > { %v484_v35 = vpop.trf.xlu1 }
 0x172   : > { %v485_v36 = vpop.trf.xlu1 }
 0x173   : > { %1259 = vmatmul.mubr.msk.bf16.gmra.mrb[16].mxu0 %vm306_vm1, %v482_v33 }
 0x174   : > { %638 = vmatprep.mubr.bf16.mxu0 %v1467_v0 }
 0x176   : > { %v486_v37 = vpop.trf.xlu1 }
 0x17a   : > { %v495_v38 = vpop.trf.xlu1 }
 0x17b   : > { %1260 = vmatmul.mubr.msk.bf16.gmra.mrb[20].mxu0 %vm306_vm1, %v483_v34 }
 0x17c   : > { %648 = vmatprep.mubr.bf16.mxu0 %v1467_v0 }
 0x17e   : > { %v496_v39 = vpop.trf.xlu1 }
 0x182   : > { %v497_v40 = vpop.trf.xlu1 }
 0x183   : > { %1261 = vmatmul.mubr.msk.bf16.gmra.mrb[24].mxu0 %vm306_vm1, %v484_v35 }
 0x184   : > { %658 = vmatprep.mubr.bf16.mxu0 %v1467_v0 }
 0x186   : > { %v498_v41 = vpop.trf.xlu1 }
 0x18a   : > { %v499_v42 = vpop.trf.xlu1 }
 0x18b   : > { %1262 = vmatmul.mubr.msk.bf16.gmra.mrb[28].mxu0 %vm306_vm1, %v485_v36 }
 0x18c   : > { %668 = vmatprep.mubr.bf16.mxu0 %v1467_v0 }
 0x18e   : > { %v500_v43 = vpop.trf.xlu1 }
 0x192   : > { %v501_v44 = vpop.trf.xlu1 }
 0x193   : > { %1263 = vmatmul.mubr.msk.bf16.gmra.mrb[32].mxu0 %vm306_vm1, %v486_v37 }
 0x194   : > { %678 = vmatprep.mubr.bf16.mxu0 %v1467_v0 }
 0x196   : > { %v502_v45 = vpop.trf.xlu1 }
 0x19b   : > { %1264 = vmatmul.mubr.msk.bf16.gmra.mrb[36].mxu0 %vm306_vm1, %v495_v38 }
 0x19c   : > { %688 = vmatprep.mubr.bf16.mxu0 %v1467_v0 }
 0x1a3   : > { %1265 = vmatmul.mubr.msk.bf16.gmra.mrb[40].mxu0 %vm306_vm1, %v496_v39 }
 0x1a4   : > { %698 = vmatprep.mubr.bf16.mxu0 %v1467_v0 }
 0x1ab   : > { %1266 = vmatmul.mubr.msk.bf16.gmra.mrb[44].mxu0 %vm306_vm1, %v497_v40 }
 0x1ac   : > { %708 = vmatprep.mubr.bf16.mxu0 %v1467_v0 }
 0x1b3   : > { %1267 = vmatmul.mubr.msk.bf16.gmra.mrb[48].mxu0 %vm306_vm1, %v498_v41 }
 0x1b4   : > { %718 = vmatprep.mubr.bf16.mxu0 %v1467_v0 }
 0x1bb   : > { %1268 = vmatmul.mubr.msk.bf16.gmra.mrb[52].mxu0 %vm306_vm1, %v499_v42 }
 0x1bc   : > { %728 = vmatprep.mubr.bf16.mxu0 %v1467_v0 }
 0x1c3   : > { %1269 = vmatmul.mubr.msk.bf16.gmra.mrb[56].mxu0 %vm306_vm1, %v500_v43 }
 0x1c4   : > { %738 = vmatprep.mubr.bf16.mxu0 %v1467_v0 }
 0x1cb   : > { %1270 = vmatmul.mubr.msk.bf16.gmra.mrb[60].mxu0 %vm306_vm1, %v501_v44 }
 0x1cc   : > { %748 = vmatprep.mubr.bf16.mxu0 %v1467_v0 }
 0x1d3   : > { %1271 = vmatmul.mubr.msk.bf16.gmra.mrb[64].mxu0 %vm306_vm1, %v502_v45 }
 0x22e   : > { %v1591_v46 = vpop.f32.mrb[4].mxu0 }
 0x22f   : > { %v1593_v47 = vpop.f32.mrb[5].mxu0 }
 0x230   : > { %v1595_v48 = vpop.f32.mrb[6].mxu0  ;;  %v759_v49 = vmax.f32 %v1591_v46, %v1593_v47 }
 0x231   : > { %v1599_v50 = vpop.f32.mrb[7].mxu0 }
 0x232   : > { %760 = vmax.xlane.f32.xlu0 %v759_v49  ;;  %v762_v51 = vmax.f32 %v1595_v48, %v1599_v50 }
 0x234   : > { %763 = vmax.xlane.f32.xlu1 %v762_v51 }
 0x236   : > { %v1603_v52 = vpop.f32.mrb[8].mxu0 }
 0x237   : > { %v1605_v53 = vpop.f32.mrb[9].mxu0 }
 0x238   : > { %v1607_v54 = vpop.f32.mrb[10].mxu0  ;;  %v765_v55 = vmax.f32 %v1603_v52, %v1605_v53 }
 0x239   : > { %v1611_v56 = vpop.f32.mrb[11].mxu0 }
 0x23a   : > { %766 = vmax.xlane.f32.xlu0 %v765_v55  ;;  %v768_v57 = vmax.f32 %v1607_v54, %v1611_v56 }
 0x23e   : > { %769 = vmax.xlane.f32.xlu0 %v768_v57  ;;  %v1615_v58 = vpop.f32.mrb[12].mxu0 }
 0x23f   : > { %v1617_v59 = vpop.f32.mrb[13].mxu0 }
 0x240   : > { %v1619_v60 = vpop.f32.mrb[14].mxu0  ;;  %v771_v61 = vmax.f32 %v1615_v58, %v1617_v59 }
 0x241   : > { %v1623_v62 = vpop.f32.mrb[15].mxu0 }
 0x242   : > { %772 = vmax.xlane.f32.xlu0 %v771_v61  ;;  %v774_v63 = vmax.f32 %v1619_v60, %v1623_v62 }
 0x246   : > { %775 = vmax.xlane.f32.xlu0 %v774_v63  ;;  %v1627_v0 = vpop.f32.mrb[16].mxu0 }
 0x247   : > { %v1629_v1 = vpop.f32.mrb[17].mxu0 }
 0x248   : > { %v1631_v2 = vpop.f32.mrb[18].mxu0  ;;  %v777_v3 = vmax.f32 %v1627_v0, %v1629_v1 }
 0x249   : > { %v1635_v4 = vpop.f32.mrb[19].mxu0 }
 0x24a   : > { %778 = vmax.xlane.f32.xlu0 %v777_v3  ;;  %v780_v5 = vmax.f32 %v1631_v2, %v1635_v4 }
 0x24e   : > { %781 = vmax.xlane.f32.xlu0 %v780_v5  ;;  %v1639_v6 = vpop.f32.mrb[20].mxu0 }
 0x24f   : > { %v1641_v7 = vpop.f32.mrb[21].mxu0 }
 0x250   : > { %v1643_v8 = vpop.f32.mrb[22].mxu0  ;;  %v783_v9 = vmax.f32 %v1639_v6, %v1641_v7 }
 0x251   : > { %v1647_v10 = vpop.f32.mrb[23].mxu0 }
 0x252   : > { %784 = vmax.xlane.f32.xlu0 %v783_v9  ;;  %v786_v11 = vmax.f32 %v1643_v8, %v1647_v10 }
 0x256   : > { %787 = vmax.xlane.f32.xlu0 %v786_v11  ;;  %v1651_v12 = vpop.f32.mrb[24].mxu0 }
 0x257   : > { %v1653_v13 = vpop.f32.mrb[25].mxu0 }
 0x258   : > { %v1655_v14 = vpop.f32.mrb[26].mxu0  ;;  %v789_v15 = vmax.f32 %v1651_v12, %v1653_v13 }
 0x259   : > { %v1659_v16 = vpop.f32.mrb[27].mxu0 }
 0x25a   : > { %790 = vmax.xlane.f32.xlu0 %v789_v15  ;;  %v792_v17 = vmax.f32 %v1655_v14, %v1659_v16 }
 0x25c   : > { %793 = vmax.xlane.f32.xlu1 %v792_v17 }
 0x25e   : > { %v1663_v18 = vpop.f32.mrb[28].mxu0 }
 0x25f   : > { %v1665_v19 = vpop.f32.mrb[29].mxu0 }
 0x260   : > { %v1667_v21 = vpop.f32.mrb[30].mxu0  ;;  %v795_v22 = vmax.f32 %v1663_v18, %v1665_v19 }
 0x261   : > { %v1671_v25 = vpop.f32.mrb[31].mxu0 }
 0x262   : > { %796 = vmax.xlane.f32.xlu0 %v795_v22  ;;  %v798_v26 = vmax.f32 %v1667_v21, %v1671_v25 }
 0x264   : > { %799 = vmax.xlane.f32.xlu1 %v798_v26 }
 0x266   : > { %v1675_v27 = vpop.f32.mrb[32].mxu0 }
 0x267   : > { %v1677_v28 = vpop.f32.mrb[33].mxu0 }
 0x268   : > { %v1679_v29 = vpop.f32.mrb[34].mxu0  ;;  %v801_v30 = vmax.f32 %v1675_v27, %v1677_v28 }
 0x269   : > { %v1683_v31 = vpop.f32.mrb[35].mxu0 }
 0x26a   : > { %802 = vmax.xlane.f32.xlu0 %v801_v30  ;;  %v804_v32 = vmax.f32 %v1679_v29, %v1683_v31 }
 0x26c   : > { %805 = vmax.xlane.f32.xlu1 %v804_v32 }
 0x26e   : > { %v1687_v33 = vpop.f32.mrb[36].mxu0 }
 0x26f   : > { %v1689_v34 = vpop.f32.mrb[37].mxu0 }
 0x270   : > { %v1691_v35 = vpop.f32.mrb[38].mxu0  ;;  %v807_v36 = vmax.f32 %v1687_v33, %v1689_v34 }
 0x271   : > { %v1695_v37 = vpop.f32.mrb[39].mxu0 }
 0x272   : > { %808 = vmax.xlane.f32.xlu0 %v807_v36  ;;  %v810_v38 = vmax.f32 %v1691_v35, %v1695_v37 }
 0x274   : > { %811 = vmax.xlane.f32.xlu1 %v810_v38 }
 0x276   : > { %v1699_v39 = vpop.f32.mrb[40].mxu0 }
 0x277   : > { %v1701_v40 = vpop.f32.mrb[41].mxu0 }
 0x278   : > { %v1703_v41 = vpop.f32.mrb[42].mxu0  ;;  %v813_v42 = vmax.f32 %v1699_v39, %v1701_v40 }
 0x279   : > { %v1707_v43 = vpop.f32.mrb[43].mxu0 }
 0x27a   : > { %814 = vmax.xlane.f32.xlu0 %v813_v42  ;;  %v816_v44 = vmax.f32 %v1703_v41, %v1707_v43 }
 0x27c   : > { %817 = vmax.xlane.f32.xlu1 %v816_v44 }
 0x27e   : > { %v1711_v45 = vpop.f32.mrb[44].mxu0 }
 0x27f   : > { %v1713_v49 = vpop.f32.mrb[45].mxu0 }
 0x280   : > { %v1715_v51 = vpop.f32.mrb[46].mxu0  ;;  %v819_v55 = vmax.f32 %v1711_v45, %v1713_v49 }
 0x281   : > { %v1719_v57 = vpop.f32.mrb[47].mxu0 }
 0x282   : > { %820 = vmax.xlane.f32.xlu0 %v819_v55  ;;  %v822_v61 = vmax.f32 %v1715_v51, %v1719_v57 }
 0x284   : > { %823 = vmax.xlane.f32.xlu1 %v822_v61 }
 0x286   : > { %v1723_v63 = vpop.f32.mrb[48].mxu0 }
 0x287   : > { %v1725_v3 = vpop.f32.mrb[49].mxu0 }
 0x288   : > { %v1727_v5 = vpop.f32.mrb[50].mxu0  ;;  %v825_v9 = vmax.f32 %v1723_v63, %v1725_v3 }
 0x289   : > { %v1731_v11 = vpop.f32.mrb[51].mxu0 }
 0x28a   : > { %826 = vmax.xlane.f32.xlu0 %v825_v9  ;;  %v828_v15 = vmax.f32 %v1727_v5, %v1731_v11 }
 0x28c   : > { %829 = vmax.xlane.f32.xlu1 %v828_v15 }
 0x28e   : > { %v1735_v17 = vpop.f32.mrb[52].mxu0 }
 0x28f   : > { %v1737_v22 = vpop.f32.mrb[53].mxu0 }
 0x290   : > { %v1739_v26 = vpop.f32.mrb[54].mxu0  ;;  %v831_v30 = vmax.f32 %v1735_v17, %v1737_v22 }
 0x291   : > { %v1743_v32 = vpop.f32.mrb[55].mxu0 }
 0x292   : > { %1901 = vst [vmem:[#allocation7_spill] sm:$0xff] %v1743_v32  ;;  %832 = vmax.xlane.f32.xlu0 %v831_v30  ;;  %v834_v36 = vmax.f32 %v1739_v26, %v1743_v32 }
 0x294   : > { %835 = vmax.xlane.f32.xlu1 %v834_v36 }
 0x296   : > { %v1747_v38 = vpop.f32.mrb[56].mxu0 }
 0x297   : > { %1902 = vst [vmem:[#allocation8_spill] sm:$0xff] %v1747_v38  ;;  %v1749_v42 = vpop.f32.mrb[57].mxu0 }
 0x298   : > { %1903 = vst [vmem:[#allocation9_spill] sm:$0xff] %v1749_v42  ;;  %v1751_v44 = vpop.f32.mrb[58].mxu0  ;;  %v837_v55 = vmax.f32 %v1747_v38, %v1749_v42 }
 0x299   : > { %1904 = vst [vmem:[#allocation10_spill] sm:$0xff] %v1751_v44  ;;  %v1755_v61 = vpop.f32.mrb[59].mxu0 }
 0x29a   : > { %1905 = vst [vmem:[#allocation11_spill] sm:$0xff] %v1755_v61  ;;  %838 = vmax.xlane.f32.xlu0 %v837_v55  ;;  %v840_v9 = vmax.f32 %v1751_v44, %v1755_v61 }
 0x29c   : > { %841 = vmax.xlane.f32.xlu1 %v840_v9 }
 0x29e   : > { %v1759_v15 = vpop.f32.mrb[60].mxu0 }
 0x29f   : > { %1906 = vst [vmem:[#allocation12_spill] sm:$0xff] %v1759_v15  ;;  %v1761_v30 = vpop.f32.mrb[61].mxu0 }
 0x2a0   : > { %1907 = vst [vmem:[#allocation13_spill] sm:$0xff] %v1761_v30  ;;  %v1763_v36 = vpop.f32.mrb[62].mxu0  ;;  %v843_v24 = vmax.f32 %v1759_v15, %v1761_v30 }
 0x2a1   : > { %1908 = vst [vmem:[#allocation14_spill] sm:$0xff] %v1763_v36  ;;  %v1767_v23 = vpop.f32.mrb[63].mxu0 }
 0x2a2   : > { %1909 = vst [vmem:[#allocation15_spill] sm:$0xff] %v1767_v23  ;;  %844 = vmax.xlane.f32.xlu0 %v843_v24  ;;  %v846_v20 = vmax.f32 %v1763_v36, %v1767_v23 }
 0x2a4   : > { %847 = vmax.xlane.f32.xlu1 %v846_v20  ;;  %v290_v20 = vld [vmem:[%s1881_s4 + $0x8] sm:$0x1] }
 0x2a6   : > { %v1771_v55 = vpop.f32.mrb[64].mxu0 }
 0x2a7   : > { %1910 = vst [vmem:[#allocation16_spill] sm:$0xff] %v1771_v55  ;;  %v1773_v61 = vpop.f32.mrb[65].mxu0 }
 0x2a8   : > { %1911 = vst [vmem:[#allocation17_spill] sm:$0xff] %v1773_v61  ;;  %v1775_v9 = vpop.f32.mrb[66].mxu0  ;;  %v849_v44 = vmax.f32 %v1771_v55, %v1773_v61 }
 0x2a9   : > { %1912 = vst [vmem:[#allocation18_spill] sm:$0xff] %v1775_v9  ;;  %v1779_v42 = vpop.f32.mrb[67].mxu0 }
 0x2aa   : > { %1913 = vst [vmem:[#allocation19_spill] sm:$0xff] %v1779_v42  ;;  %v852_v30 = vmax.f32 %v1775_v9, %v1779_v42  ;;  %850 = vmax.xlane.f32.xlu0 %v849_v44 }
 0x2ac   : > { %853 = vmax.xlane.f32.xlu1 %v852_v30 }
 0x2bf   : > { %v761_v24 = vpop.xlane.xlu0 %760 }
 0x2c0   : > { %v855_v23 = vsub.f32 %v1591_v46, %v761_v24  ;;  %v856_v36 = vsub.f32 %v1593_v47, %v761_v24  ;;  %298 = vperm.xlu0 %1305, %v290_v20  }
 0x2c1   : > { %v764_v15 = vpop.xlane.xlu1 %763 }
 0x2c2   : > { %v919_v38 = vmul.f32 1.442695, %v855_v23  ;;  %v921_v61 = vmul.f32 1.442695, %v856_v36  ;;  %v857_v55 = vsub.f32 %v1595_v48, %v764_v15  ;;  %v858_v32 = vsub.f32 %v1599_v50, %v764_v15 }
 0x2c4   : > { %1311 = vpow2.f32 %v919_v38  ;;  %v923_v44 = vmul.f32 1.442695, %v857_v55  ;;  %v925_v30 = vmul.f32 1.442695, %v858_v32 }
 0x2c5   : > { %1313 = vpow2.f32 %v921_v61 }
 0x2c6   : > { %1315 = vpow2.f32 %v923_v44 }
 0x2c7   : > { %1317 = vpow2.f32 %v925_v30  ;;  %v767_v42 = vpop.xlane.xlu0 %766 }
 0x2c8   : > { %v859_v9 = vsub.f32 %v1603_v52, %v767_v42  ;;  %v860_v46 = vsub.f32 %v1605_v53, %v767_v42 }
 0x2ca   : > { %v927_v47 = vmul.f32 1.442695, %v859_v9  ;;  %v929_v20 = vmul.f32 1.442695, %v860_v46 }
 0x2cb   : > { %v770_v24 = vpop.xlane.xlu0 %769 }
 0x2cc   : > { %v861_v23 = vsub.f32 %v1607_v54, %v770_v24  ;;  %v862_v48 = vsub.f32 %v1611_v56, %v770_v24  ;;  %1319 = vpow2.f32 %v927_v47 }
 0x2cd   : > { %1321 = vpow2.f32 %v929_v20 }
 0x2ce   : > { %v1312_v36 = vpop.eup %1311  ;;  %v931_v50 = vmul.f32 1.442695, %v861_v23  ;;  %v933_v38 = vmul.f32 1.442695, %v862_v48 }
 0x2cf   : > { %v1314_v32 = vpop.eup %1313  ;;  %v773_v61 = vpop.xlane.xlu0 %772 }
 0x2d0   : > { %v1316_v15 = vpop.eup %1315  ;;  %1323 = vpow2.f32 %v931_v50  ;;  %v863_v52 = vsub.f32 %v1615_v58, %v773_v61  ;;  %v864_v53 = vsub.f32 %v1617_v59, %v773_v61  ;;  %v1139_v58 = vld [vmem:[%s1882_s5] sm:$0xf] }
 0x2d1   : > { %v1318_v42 = vpop.eup %1317  ;;  %1325 = vpow2.f32 %v933_v38  ;;  %v1047_v55 = vpack.c.bf16 %v1316_v15, %v1312_v36  ;;  %1142 = vperm.xlu1 %1306, %v1139_v58  }
 0x2d2   : > { %v935_v9 = vmul.f32 1.442695, %v863_v52  ;;  %v1048_v54 = vpack.c.bf16 %v1318_v42, %v1314_v32  ;;  %v937_v44 = vmul.f32 1.442695, %v864_v53 }
 0x2d3   : > { %v776_v56 = vpop.xlane.xlu0 %775 }
 0x2d4   : > { %1086 = vmatprep.subr.bf16.mxu1 %v1048_v54  ;;  %v865_v30 = vsub.f32 %v1619_v60, %v776_v56  ;;  %v866_v46 = vsub.f32 %v1623_v62, %v776_v56  ;;  %1327 = vpow2.f32 %v935_v9 }
 0x2d5   : > { %1087 = vmatpush1.bf16.xpose.msra.mxu1 %v1047_v55  ;;  %1329 = vpow2.f32 %v937_v44 }
 0x2d6   : > { %v939_v47 = vmul.f32 1.442695, %v865_v30  ;;  %v941_v20 = vmul.f32 1.442695, %v866_v46  ;;  %v1320_v24 = vpop.eup %1319 }
 0x2d7   : > { %v779_v59 = vpop.xlane.xlu0 %778  ;;  %v1322_v60 = vpop.eup %1321 }
 0x2d8   : > { %1331 = vpow2.f32 %v939_v47  ;;  %v867_v23 = vsub.f32 %v1627_v0, %v779_v59  ;;  %v868_v48 = vsub.f32 %v1629_v1, %v779_v59 }
 0x2d9   : > { %1333 = vpow2.f32 %v941_v20 }
 0x2da   : > { %v1324_v62 = vpop.eup %1323  ;;  %v943_v36 = vmul.f32 1.442695, %v867_v23  ;;  %v945_v38 = vmul.f32 1.442695, %v868_v48 }
 0x2db   : > { %v1326_v50 = vpop.eup %1325  ;;  %v782_v32 = vpop.xlane.xlu0 %781  ;;  %v1049_v61 = vpack.c.bf16 %v1324_v62, %v1320_v24 }
 0x2dc   : > { %v869_v15 = vsub.f32 %v1631_v2, %v782_v32  ;;  %v870_v52 = vsub.f32 %v1635_v4, %v782_v32  ;;  %v1050_v53 = vpack.c.bf16 %v1326_v50, %v1322_v60  ;;  %1335 = vpow2.f32 %v943_v36 }
 0x2dd   : > { %1337 = vpow2.f32 %v945_v38 }
 0x2de   : > { %v947_v42 = vmul.f32 1.442695, %v869_v15  ;;  %v949_v55 = vmul.f32 1.442695, %v870_v52  ;;  %1088 = vmatprep.subr.bf16.mxu1 %v1050_v53  ;;  %v1328_v1 = vpop.eup %1327 }
 0x2df   : > { %1089 = vmatpush1.bf16.xpose.msra.mxu1 %v1049_v61  ;;  %v785_v0 = vpop.xlane.xlu0 %784  ;;  %v1330_v44 = vpop.eup %1329 }
 0x2e0   : > { %1339 = vpow2.f32 %v947_v42  ;;  %v871_v9 = vsub.f32 %v1639_v6, %v785_v0  ;;  %v872_v54 = vsub.f32 %v1641_v7, %v785_v0 }
 0x2e1   : > { %1341 = vpow2.f32 %v949_v55 }
 0x2e2   : > { %v1332_v56 = vpop.eup %1331  ;;  %v951_v2 = vmul.f32 1.442695, %v871_v9  ;;  %v953_v4 = vmul.f32 1.442695, %v872_v54 }
 0x2e3   : > { %v1334_v30 = vpop.eup %1333  ;;  %v788_v46 = vpop.xlane.xlu0 %787  ;;  %v1051_v47 = vpack.c.bf16 %v1332_v56, %v1328_v1 }
 0x2e4   : > { %v873_v20 = vsub.f32 %v1643_v8, %v788_v46  ;;  %v874_v58 = vsub.f32 %v1647_v10, %v788_v46  ;;  %v1052_v59 = vpack.c.bf16 %v1334_v30, %v1330_v44  ;;  %1343 = vpow2.f32 %v951_v2 }
 0x2e5   : > { %1345 = vpow2.f32 %v953_v4 }
 0x2e6   : > { %v955_v24 = vmul.f32 1.442695, %v873_v20  ;;  %v957_v23 = vmul.f32 1.442695, %v874_v58  ;;  %1090 = vmatprep.subr.bf16.mxu1 %v1052_v59  ;;  %v1336_v7 = vpop.eup %1335 }
 0x2e7   : > { %1091 = vmatpush1.bf16.xpose.msra.mxu1 %v1051_v47  ;;  %v791_v6 = vpop.xlane.xlu0 %790  ;;  %v1338_v62 = vpop.eup %1337 }
 0x2e8   : > { %1347 = vpow2.f32 %v955_v24  ;;  %v875_v48 = vsub.f32 %v1651_v12, %v791_v6  ;;  %v876_v60 = vsub.f32 %v1653_v13, %v791_v6 }
 0x2e9   : > { %1349 = vpow2.f32 %v957_v23  ;;  %v794_v36 = vpop.xlane.xlu1 %793 }
 0x2ea   : > { %v1340_v8 = vpop.eup %1339  ;;  %v959_v50 = vmul.f32 1.442695, %v875_v48  ;;  %v877_v10 = vsub.f32 %v1655_v14, %v794_v36  ;;  %v878_v38 = vsub.f32 %v1659_v16, %v794_v36  ;;  %v961_v15 = vmul.f32 1.442695, %v876_v60 }
 0x2eb   : > { %v1342_v32 = vpop.eup %1341  ;;  %v1053_v61 = vpack.c.bf16 %v1340_v8, %v1336_v7 }
 0x2ec   : > { %v963_v52 = vmul.f32 1.442695, %v877_v10  ;;  %v965_v53 = vmul.f32 1.442695, %v878_v38  ;;  %v1054_v42 = vpack.c.bf16 %v1342_v32, %v1338_v62  ;;  %1351 = vpow2.f32 %v959_v50 }
 0x2ee   : > { %1353 = vpow2.f32 %v963_v52  ;;  %1092 = vmatprep.subr.bf16.mxu1 %v1054_v42  ;;  %v1344_v13 = vpop.eup %1343 }
 0x2ef   : > { %1355 = vpow2.f32 %v965_v53  ;;  %1093 = vmatpush1.bf16.xpose.msra.mxu1 %v1053_v61  ;;  %v797_v12 = vpop.xlane.xlu0 %796  ;;  %v1346_v0 = vpop.eup %1345 }
 0x2f0   : > { %1357 = vpow2.f32 %v961_v15  ;;  %v879_v55 = vsub.f32 %v1663_v18, %v797_v12  ;;  %v880_v14 = vsub.f32 %v1665_v19, %v797_v12 }
 0x2f1   : > { %v800_v16 = vpop.xlane.xlu1 %799 }
 0x2f2   : > { %v1348_v1 = vpop.eup %1347  ;;  %v967_v9 = vmul.f32 1.442695, %v879_v55  ;;  %v881_v54 = vsub.f32 %v1667_v21, %v800_v16  ;;  %v882_v44 = vsub.f32 %v1671_v25, %v800_v16  ;;  %v969_v30 = vmul.f32 1.442695, %v880_v14 }
 0x2f3   : > { %v1350_v56 = vpop.eup %1349  ;;  %v1055_v2 = vpack.c.bf16 %v1348_v1, %v1344_v13 }
 0x2f4   : > { %v971_v4 = vmul.f32 1.442695, %v881_v54  ;;  %v973_v46 = vmul.f32 1.442695, %v882_v44  ;;  %v1056_v47 = vpack.c.bf16 %v1350_v56, %v1346_v0  ;;  %1359 = vpow2.f32 %v967_v9 }
 0x2f6   : > { %1361 = vpow2.f32 %v971_v4  ;;  %1094 = vmatprep.subr.bf16.mxu1 %v1056_v47  ;;  %v1352_v18 = vpop.eup %1351 }
 0x2f7   : > { %1363 = vpow2.f32 %v973_v46  ;;  %1095 = vmatpush1.bf16.xpose.msra.mxu1 %v1055_v2  ;;  %v803_v19 = vpop.xlane.xlu0 %802 }
 0x2f8   : > { %v1354_v20 = vpop.eup %1353  ;;  %1365 = vpow2.f32 %v969_v30  ;;  %v883_v58 = vsub.f32 %v1675_v27, %v803_v19  ;;  %v884_v21 = vsub.f32 %v1677_v28, %v803_v19 }
 0x2f9   : > { %v1356_v25 = vpop.eup %1355  ;;  %v806_v59 = vpop.xlane.xlu1 %805  ;;  %v1057_v24 = vpack.c.bf16 %v1354_v20, %v1352_v18 }
 0x2fa   : > { %v1358_v23 = vpop.eup %1357  ;;  %v975_v6 = vmul.f32 1.442695, %v883_v58  ;;  %v885_v7 = vsub.f32 %v1679_v29, %v806_v59  ;;  %v886_v48 = vsub.f32 %v1683_v31, %v806_v59  ;;  %v977_v62 = vmul.f32 1.442695, %v884_v21 }
 0x2fb   : > { %v1058_v60 = vpack.c.bf16 %v1356_v25, %v1358_v23 }
 0x2fc   : > { %v979_v36 = vmul.f32 1.442695, %v885_v7  ;;  %v981_v8 = vmul.f32 1.442695, %v886_v48  ;;  %1367 = vpow2.f32 %v975_v6 }
 0x2fd   : > { %1096 = vmatprep.subr.bf16.mxu1 %v1058_v60 }
 0x2fe   : > { %1369 = vpow2.f32 %v979_v36  ;;  %v1360_v50 = vpop.eup %1359 }
 0x2ff   : > { %1371 = vpow2.f32 %v981_v8  ;;  %1097 = vmatpush1.bf16.xpose.msra.mxu1 %v1057_v24  ;;  %v809_v27 = vpop.xlane.xlu0 %808 }
 0x300   : > { %v1362_v28 = vpop.eup %1361  ;;  %1373 = vpow2.f32 %v977_v62  ;;  %v887_v10 = vsub.f32 %v1687_v33, %v809_v27  ;;  %v888_v38 = vsub.f32 %v1689_v34, %v809_v27 }
 0x301   : > { %v1364_v29 = vpop.eup %1363  ;;  %v812_v32 = vpop.xlane.xlu1 %811  ;;  %v1059_v31 = vpack.c.bf16 %v1362_v28, %v1360_v50 }
 0x302   : > { %v1366_v61 = vpop.eup %1365  ;;  %v983_v15 = vmul.f32 1.442695, %v887_v10  ;;  %v889_v52 = vsub.f32 %v1691_v35, %v812_v32  ;;  %v890_v53 = vsub.f32 %v1695_v37, %v812_v32  ;;  %v985_v12 = vmul.f32 1.442695, %v888_v38 }
 0x303   : > { %v1060_v42 = vpack.c.bf16 %v1364_v29, %v1366_v61 }
 0x304   : > { %v987_v13 = vmul.f32 1.442695, %v889_v52  ;;  %v989_v55 = vmul.f32 1.442695, %v890_v53  ;;  %1375 = vpow2.f32 %v983_v15 }
 0x305   : > { %1098 = vmatprep.subr.bf16.mxu1 %v1060_v42 }
 0x306   : > { %1377 = vpow2.f32 %v987_v13  ;;  %v1368_v14 = vpop.eup %1367  ;;  %v1914_v13 = vld [vmem:[#allocation7_spill] sm:$0xff] }
 0x307   : > { %1379 = vpow2.f32 %v989_v55  ;;  %1099 = vmatpush1.bf16.xpose.msra.mxu1 %v1059_v31  ;;  %v815_v33 = vpop.xlane.xlu0 %814 }
 0x308   : > { %v1370_v34 = vpop.eup %1369  ;;  %1381 = vpow2.f32 %v985_v12  ;;  %v891_v0 = vsub.f32 %v1699_v39, %v815_v33  ;;  %v892_v16 = vsub.f32 %v1701_v40, %v815_v33 }
 0x309   : > { %v1372_v35 = vpop.eup %1371  ;;  %v818_v1 = vpop.xlane.xlu1 %817  ;;  %v1061_v37 = vpack.c.bf16 %v1370_v34, %v1368_v14 }
 0x30a   : > { %v1374_v9 = vpop.eup %1373  ;;  %v991_v54 = vmul.f32 1.442695, %v891_v0  ;;  %v893_v44 = vsub.f32 %v1703_v41, %v818_v1  ;;  %v894_v56 = vsub.f32 %v1707_v43, %v818_v1  ;;  %v993_v30 = vmul.f32 1.442695, %v892_v16 }
 0x30b   : > { %v1062_v2 = vpack.c.bf16 %v1372_v35, %v1374_v9  ;;  %v1915_v35 = vld [vmem:[#allocation8_spill] sm:$0xff] }
 0x30c   : > { %v995_v4 = vmul.f32 1.442695, %v893_v44  ;;  %v997_v46 = vmul.f32 1.442695, %v894_v56  ;;  %1383 = vpow2.f32 %v991_v54 }
 0x30d   : > { %1100 = vmatprep.subr.bf16.mxu1 %v1062_v2 }
 0x30e   : > { %1385 = vpow2.f32 %v995_v4  ;;  %v1376_v47 = vpop.eup %1375 }
 0x30f   : > { %1387 = vpow2.f32 %v997_v46  ;;  %1101 = vmatpush1.bf16.xpose.msra.mxu1 %v1061_v37  ;;  %v821_v39 = vpop.xlane.xlu0 %820  ;;  %v1916_v37 = vld [vmem:[#allocation9_spill] sm:$0xff]  ;;  %v1918_v46 = vld [vmem:[#allocation11_spill] sm:$0xff] }
 0x310   : > { %v1378_v40 = vpop.eup %1377  ;;  %1389 = vpow2.f32 %v993_v30  ;;  %v895_v18 = vsub.f32 %v1711_v45, %v821_v39  ;;  %v896_v19 = vsub.f32 %v1713_v49, %v821_v39  ;;  %v1917_v30 = vld [vmem:[#allocation10_spill] sm:$0xff] }
 0x311   : > { %v1380_v41 = vpop.eup %1379  ;;  %v824_v20 = vpop.xlane.xlu1 %823  ;;  %v1063_v43 = vpack.c.bf16 %v1378_v40, %v1376_v47 }
 0x312   : > { %v1382_v58 = vpop.eup %1381  ;;  %v999_v21 = vmul.f32 1.442695, %v895_v18  ;;  %v897_v25 = vsub.f32 %v1715_v51, %v824_v20  ;;  %v898_v59 = vsub.f32 %v1719_v57, %v824_v20  ;;  %v1001_v23 = vmul.f32 1.442695, %v896_v19 }
 0x313   : > { %v1064_v24 = vpack.c.bf16 %v1380_v41, %v1382_v58  ;;  %v1919_v58 = vld [vmem:[#allocation12_spill] sm:$0xff] }
 0x314   : > { %v1003_v6 = vmul.f32 1.442695, %v897_v25  ;;  %v1005_v7 = vmul.f32 1.442695, %v898_v59  ;;  %1391 = vpow2.f32 %v999_v21  ;;  %v1920_v25 = vld [vmem:[#allocation13_spill] sm:$0xff] }
 0x315   : > { %1102 = vmatprep.subr.bf16.mxu1 %v1064_v24 }
 0x316   : > { %1393 = vpow2.f32 %v1003_v6  ;;  %v1384_v48 = vpop.eup %1383 }
 0x317   : > { %1395 = vpow2.f32 %v1005_v7  ;;  %1103 = vmatpush1.bf16.xpose.msra.mxu1 %v1063_v43  ;;  %v827_v45 = vpop.xlane.xlu0 %826 }
 0x318   : > { %v1386_v49 = vpop.eup %1385  ;;  %1397 = vpow2.f32 %v1001_v23  ;;  %v899_v60 = vsub.f32 %v1723_v63, %v827_v45  ;;  %v900_v62 = vsub.f32 %v1725_v3, %v827_v45 }
 0x319   : > { %v1388_v51 = vpop.eup %1387  ;;  %v830_v36 = vpop.xlane.xlu1 %829  ;;  %v1065_v57 = vpack.c.bf16 %v1386_v49, %v1384_v48  ;;  %v1921_v49 = vld [vmem:[#allocation14_spill] sm:$0xff] }
 0x31a   : > { %v1390_v8 = vpop.eup %1389  ;;  %v1007_v50 = vmul.f32 1.442695, %v899_v60  ;;  %v901_v27 = vsub.f32 %v1727_v5, %v830_v36  ;;  %v902_v28 = vsub.f32 %v1731_v11, %v830_v36  ;;  %v1009_v38 = vmul.f32 1.442695, %v900_v62  ;;  %v1922_v62 = vld [vmem:[#allocation15_spill] sm:$0xff] }
 0x31b   : > { %v1066_v10 = vpack.c.bf16 %v1388_v51, %v1390_v8 }
 0x31c   : > { %v1011_v29 = vmul.f32 1.442695, %v901_v27  ;;  %v1013_v32 = vmul.f32 1.442695, %v902_v28  ;;  %1399 = vpow2.f32 %v1007_v50 }
 0x31d   : > { %1104 = vmatprep.subr.bf16.mxu1 %v1066_v10  ;;  %v1923_v10 = vld [vmem:[#allocation16_spill] sm:$0xff] }
 0x31e   : > { %1401 = vpow2.f32 %v1011_v29  ;;  %v1392_v31 = vpop.eup %1391  ;;  %v1924_v29 = vld [vmem:[#allocation17_spill] sm:$0xff] }
 0x31f   : > { %1403 = vpow2.f32 %v1013_v32  ;;  %1105 = vmatpush1.bf16.xpose.msra.mxu1 %v1065_v57  ;;  %v833_v63 = vpop.xlane.xlu0 %832 }
 0x320   : > { %v1394_v3 = vpop.eup %1393  ;;  %1405 = vpow2.f32 %v1009_v38  ;;  %v903_v61 = vsub.f32 %v1735_v17, %v833_v63  ;;  %v904_v15 = vsub.f32 %v1737_v22, %v833_v63 }
 0x321   : > { %v1396_v5 = vpop.eup %1395  ;;  %v836_v52 = vpop.xlane.xlu1 %835  ;;  %v1067_v11 = vpack.c.bf16 %v1394_v3, %v1392_v31 }
 0x322   : > { %v1398_v53 = vpop.eup %1397  ;;  %v1015_v42 = vmul.f32 1.442695, %v903_v61  ;;  %v905_v12 = vsub.f32 %v1739_v26, %v836_v52  ;;  %v906_v55 = vsub.f32 %v1914_v13, %v836_v52  ;;  %v1017_v33 = vmul.f32 1.442695, %v904_v15  ;;  %v1925_v52 = vld [vmem:[#allocation18_spill] sm:$0xff] }
 0x323   : > { %v1068_v14 = vpack.c.bf16 %v1396_v5, %v1398_v53  ;;  %v1926_v53 = vld [vmem:[#allocation19_spill] sm:$0xff] }
 0x324   : > { %v1019_v34 = vmul.f32 1.442695, %v905_v12  ;;  %v1021_v0 = vmul.f32 1.442695, %v906_v55  ;;  %1407 = vpow2.f32 %v1015_v42 }
 0x325   : > { %1106 = vmatprep.subr.bf16.mxu1 %v1068_v14 }
 0x326   : > { %1409 = vpow2.f32 %v1019_v34  ;;  %v1400_v16 = vpop.eup %1399 }
 0x327   : > { %1411 = vpow2.f32 %v1021_v0  ;;  %1107 = vmatpush1.bf16.xpose.msra.mxu1 %v1067_v11  ;;  %v839_v17 = vpop.xlane.xlu0 %838 }
 0x328   : > { %v1402_v22 = vpop.eup %1401  ;;  %1413 = vpow2.f32 %v1017_v33  ;;  %v907_v1 = vsub.f32 %v1915_v35, %v839_v17  ;;  %v908_v9 = vsub.f32 %v1916_v37, %v839_v17  ;;  %v1929_v17 = vld [vmem:[#allocation4_spill] sm:$0xff]  ;;  %v1930_v35 = vld [vmem:[#allocation5_spill] sm:$0xff] }
 0x329   : > { %v1404_v26 = vpop.eup %1403  ;;  %v842_v54 = vpop.xlane.xlu1 %841  ;;  %v1069_v44 = vpack.c.bf16 %v1402_v22, %v1400_v16 }
 0x32a   : > { %v1406_v56 = vpop.eup %1405  ;;  %v1023_v2 = vmul.f32 1.442695, %v907_v1  ;;  %v909_v4 = vsub.f32 %v1917_v30, %v842_v54  ;;  %v910_v47 = vsub.f32 %v1918_v46, %v842_v54  ;;  %v1025_v40 = vmul.f32 1.442695, %v908_v9 }
 0x32b   : > { %v1070_v39 = vpack.c.bf16 %v1404_v26, %v1406_v56 }
 0x32c   : > { %v1027_v18 = vmul.f32 1.442695, %v909_v4  ;;  %v1029_v19 = vmul.f32 1.442695, %v910_v47  ;;  %1415 = vpow2.f32 %v1023_v2  ;;  %v395_v2 = vld [vmem:[#allocation3] sm:$0x77] }
 0x32d   : > { %1108 = vmatprep.subr.bf16.mxu1 %v1070_v39 }
 0x32e   : > { %1417 = vpow2.f32 %v1027_v18  ;;  %v1408_v41 = vpop.eup %1407 }
 0x32f   : > { %1419 = vpow2.f32 %v1029_v19  ;;  %1109 = vmatpush1.bf16.xpose.msra.mxu1 %v1069_v44  ;;  %v845_v20 = vpop.xlane.xlu0 %844  ;;  %v1931_v44 = vld [vmem:[#allocation6_spill] sm:$0xff] }
 0x330   : > { %v1410_v43 = vpop.eup %1409  ;;  %1421 = vpow2.f32 %v1025_v40  ;;  %v911_v21 = vsub.f32 %v1919_v58, %v845_v20  ;;  %v912_v59 = vsub.f32 %v1920_v25, %v845_v20  ;;  %v1251_v56 = vrot.slane %v1931_v44, 10 }
 0x331   : > { %v1412_v24 = vpop.eup %1411  ;;  %v848_v23 = vpop.xlane.xlu1 %847  ;;  %v1071_v6 = vpack.c.bf16 %v1410_v43, %v1408_v41  ;;  %v1129_v25 = vlaneseq }
 0x332   : > { %v1414_v7 = vpop.eup %1413  ;;  %v1031_v48 = vmul.f32 1.442695, %v911_v21  ;;  %v1033_v45 = vmul.f32 1.442695, %v912_v59  ;;  %v913_v60 = vsub.f32 %v1921_v49, %v848_v23  ;;  %v914_v51 = vsub.f32 %v1922_v62, %v848_v23 }
 0x333   : > { %v1072_v36 = vpack.c.bf16 %v1412_v24, %v1414_v7 }
 0x334   : > { %1423 = vpow2.f32 %v1031_v48  ;;  %v1035_v57 = vmul.f32 1.442695, %v913_v60  ;;  %v1037_v8 = vmul.f32 1.442695, %v914_v51 }
 0x335   : > { %1425 = vpow2.f32 %v1033_v45  ;;  %1110 = vmatprep.subr.bf16.mxu1 %v1072_v36 }
 0x336   : > { %1427 = vpow2.f32 %v1035_v57  ;;  %v1416_v50 = vpop.eup %1415 }
 0x337   : > { %1429 = vpow2.f32 %v1037_v8  ;;  %1111 = vmatpush1.bf16.xpose.msra.mxu1 %v1071_v6  ;;  %v851_v27 = vpop.xlane.xlu0 %850  ;;  %v1130_v6 = vshrl.u32 %v1129_v25, 7 }
 0x338   : > { %v1418_v28 = vpop.eup %1417  ;;  %v915_v38 = vsub.f32 %v1923_v10, %v851_v27  ;;  %v916_v32 = vsub.f32 %v1924_v29, %v851_v27 }
 0x339   : > { %v1420_v31 = vpop.eup %1419  ;;  %v854_v63 = vpop.xlane.xlu1 %853  ;;  %v1073_v3 = vpack.c.bf16 %v1418_v28, %v1416_v50  ;;  %v1131_v7 = vsub.s32 4, %v1130_v6 }
 0x33a   : > { %v1422_v61 = vpop.eup %1421  ;;  %v1039_v15 = vmul.f32 1.442695, %v915_v38  ;;  %v1041_v5 = vmul.f32 1.442695, %v916_v32  ;;  %v917_v11 = vsub.f32 %v1925_v52, %v854_v63  ;;  %v918_v42 = vsub.f32 %v1926_v53, %v854_v63 }
 0x33b   : > { %v1074_v12 = vpack.c.bf16 %v1420_v31, %v1422_v61 }
 0x33c   : > { %1431 = vpow2.f32 %v1039_v15  ;;  %v1043_v13 = vmul.f32 1.442695, %v917_v11  ;;  %v1045_v55 = vmul.f32 1.442695, %v918_v42 }
 0x33d   : > { %1433 = vpow2.f32 %v1041_v5  ;;  %1112 = vmatprep.subr.bf16.mxu1 %v1074_v12 }
 0x33e   : > { %v1424_v14 = vpop.eup %1423  ;;  %1435 = vpow2.f32 %v1043_v13 }
 0x33f   : > { %v1426_v33 = vpop.eup %1425  ;;  %1437 = vpow2.f32 %v1045_v55  ;;  %1113 = vmatpush1.bf16.xpose.msra.mxu1 %v1073_v3  ;;  %v299_v34 = vpop.permute.xlu0 %298 }
 0x340   : > { %v1428_v0 = vpop.eup %1427  ;;  %v356_v22 = vadd.f32 %v1929_v17, %v299_v34  ;;  %v358_v1 = vadd.f32 %v1930_v35, %v299_v34 }
 0x341   : > { %v1430_v37 = vpop.eup %1429  ;;  %v1075_v9 = vpack.c.bf16 %v1428_v0, %v1424_v14 }
 0x342   : > { %v1279_v26 = vpack.c.bf16 %v358_v1, %v356_v22  ;;  %v1076_v54 = vpack.c.bf16 %v1430_v37, %v1426_v33 }
 0x344   : > { %v385_v30 = vrot.slane %v1279_v26, 6  ;;  %1114 = vmatprep.subr.bf16.mxu1 %v1076_v54 }
 0x346   : > { %v1432_v4 = vpop.eup %1431  ;;  %v386_v46 = vsel %vm382_vm9, %v1251_v56, %v385_v30 }
 0x347   : > { %v1434_v47 = vpop.eup %1433  ;;  %v396_v39 = vsel %vm394_vm10, %v386_v46, %v395_v2  ;;  %1115 = vmatpush1.bf16.xpose.msra.mxu1 %v1075_v9 }
 0x348   : > { %v1436_v40 = vpop.eup %1435  ;;  %397 = vst [vmem:[#allocation3] sm:$0x77] %v396_v39 }
 0x349   : > { %v1438_v18 = vpop.eup %1437  ;;  %v1077_v19 = vpack.c.bf16 %v1436_v40, %v1432_v4 }
 0x34a   : > { %v1078_v41 = vpack.c.bf16 %v1438_v18, %v1434_v47 }
 0x34c   : > { %1116 = vmatprep.subr.bf16.mxu1 %v1078_v41 }
 0x34f   : > { %1117 = vmatpush1.bf16.xpose.msra.mxu1 %v1077_v19  ;;  %v470_v20 = vld [vmem:[#allocation3] sm:$0x77] }
 0x350   : > { %v1273_v43 = vcombine.high %v470_v20, %v470_v20  ;;  %v1272_v58 = vcombine.low %v470_v20, %v470_v20  ;;  %v1143_v62 = vpop.permute.xlu1 %1142 }
 0x352   : > { %1118 = vmatprep.mubr.bf16.mxu1 %v1273_v43 }
 0x356   : > { %1119 = vmatmul.mubr.bf16.vlgmr.msra.gmra.mrb[4].mxu1 %v1272_v58 }
 0x429   : > { %v1120_v21 = vpop.f32.mrb[4].mxu1 }
 0x42a   : > { %1439 = vrcp.f32 %v1120_v21  ;;  %v1122_v59 = vpop.f32.mrb[5].mxu1 }
 0x42b   : > { %1441 = vrcp.f32 %v1122_v59  ;;  %v1124_v24 = vpop.f32.mrb[6].mxu1 }
 0x42c   : > { %v1125_v23 = vpop.f32.mrb[7].mxu1 }
 0x434   : > { %v1440_v48 = vpop.eup %1439 }
 0x435   : > { %v1442_v45 = vpop.eup %1441  ;;  %v1132_v49 = vrot.slane %v1440_v48, %v1131_v7 }
 0x436   : > { %v1136_v60 = vrot.slane %v1442_v45, %v1131_v7 }
 0x437   : > { %v1137_v51 = vmul.f32 %v1132_v49, %v1120_v21 }
 0x438   : > { %v1138_v36 = vmul.f32 %v1136_v60, %v1122_v59 }
 0x439   : > { %v1145_v57 = vadd.f32 %v1143_v62, %v1137_v51 }
 0x43a   : > { %v1146_v8 = vadd.f32 %v1143_v62, %v1138_v36 }
 0x43c   : > { %v1149_v50 = vcombine.low %v1145_v57, %v1146_v8 }
 0x43e   : > { %1151 = vst [vmem:[%s273_s19] sm:$0xff] %v1149_v50 }
 0x43f PF: > { %s16_s23 = sadd.s32 1, %s1465_s23   ;;  %s1932_s21 = smov %s1461_s22 }
 0x440   : > { %p13_p5 = scmp.ge.s32.totalorder %s16_s23, 4   ;;  %s1933_s22 = smov %s1935_s24 }
 0x442   :  { %15 = sbr.rel (!%p13_p5) target bundleno = 2 (0x2), region = 79 }

</bundles_post_ra>
